<compile_context>
chip_gen: v7x
topology: tpu7x:2x2x1
jax: 0.10.0
libtpu: 0.0.40
codegen_flags: <defaults>
</compile_context>

<pallas_src>
import functools

import jax
import jax.numpy as jnp
from jax.experimental import pallas as pl
from jax.experimental.pallas import tpu as pltpu


def _conv_kernel(x_ref, w_ref, b_ref, o_ref, pad_ref, slab_ref, *,
                 h, w, ksize, stride, padding, oh, ow, wp, out_len,
                 cin, cout, apply_relu):
    """One grid step = one image of the batch.

    x_ref   : (1, Cin, H*W)        flat NCHW input (lane-dense)
    w_ref   : (Cout, KH*KW*Cin)    folded conv weight
    b_ref   : (Cout, 1)            bias
    o_ref   : (1, Cout, OH*OW)     flat NCHW output (lane-dense)
    pad_ref : (Cin, Hp*Wp)         VMEM scratch: zero-padded flat image
    slab_ref: (KH*KW*Cin, L)       VMEM scratch: im2col-lite slab
    """
    kh_sz, kw_sz = ksize

    # -- 1. zero-pad into VMEM (channels on sublanes, spatial flat on lanes) --
    if padding > 0:
        pad_ref[...] = jnp.zeros_like(pad_ref)
        for r in range(h):
            dst = (r + padding) * wp + padding
            pad_ref[:, dst:dst + w] = x_ref[0, :, r * w:(r + 1) * w]
    else:
        pad_ref[...] = x_ref[0]

    # -- 2. im2col-lite: each tap is a pure lane-shift of the flat image ------
    # slab[t*Cin + c, i*Wp + j] = xpad[c, (i*stride + kh)*Wp + (j*stride + kw)]
    # Columns j in [OW, Wp) are junk (row wrap-around) and are compacted away
    # in step 4; max read index is exactly Hp*Wp - 1 (no OOB).
    for t_kh in range(kh_sz):
        for t_kw in range(kw_sz):
            t = t_kh * kw_sz + t_kw
            shift = t_kh * wp + t_kw
            if stride == 1:
                piece = pad_ref[:, shift:shift + out_len]
            else:
                # TODO(synk): strided lane read; for production stride>1 prefer
                # an OW-tiled grid axis instead of an in-kernel strided slice.
                piece = pad_ref[:, pl.ds(shift, out_len, stride)]
            slab_ref[t * cin:(t + 1) * cin, :] = piece

    # -- 3. single MXU matmul, spatial on the MXU result / lane axis ----------
    acc = jnp.dot(w_ref[...], slab_ref[...],
                  preferred_element_type=jnp.float32)          # (Cout, L) f32
    acc = acc + b_ref[...].astype(jnp.float32)                 # bias in f32
    if apply_relu:
        acc = jnp.maximum(acc, 0.0)
    # TODO(synk): norm_layer (e.g. BatchNorm2d) is not instantiated by default
    # in ConvBlock; if used it folds into a per-channel scale/shift here.
    acc = acc.astype(o_ref.dtype)

    # -- 4. compact the padded-width junk columns -> lane-dense output --------
    if ow == wp:
        o_ref[0] = acc
    else:
        for i in range(oh):
            o_ref[0, :, i * ow:(i + 1) * ow] = acc[:, i * wp:i * wp + ow]


def conv_block_forward(x_nchw, weight, bias, *, stride=1, padding=0,
                       apply_relu=False):
    """Pallas ConvBlock forward.

    x_nchw : (N, Cin, H, W)      -- PyTorch layout
    weight : (Cout, Cin, KH, KW) -- PyTorch Conv2d layout
    bias   : (Cout,)
    returns: (N, Cout, OH, OW)
    """
    n, cin, h, w = x_nchw.shape
    cout, cin_w, kh_sz, kw_sz = weight.shape
    assert cin == cin_w

    oh = (h + 2 * padding - kh_sz) // stride + 1
    ow = (w + 2 * padding - kw_sz) // stride + 1
    hp, wp = h + 2 * padding, w + 2 * padding
    k_dim = kh_sz * kw_sz * cin
    out_len = (oh - 1) * wp + ow        # slab / accumulator width (t-domain)

    # ---- glue: metadata-only reshapes + O(K) weight repack (no activation
    # transposes, no padded HBM copy) ----------------------------------------
    x_flat = x_nchw.reshape(n, cin, h * w)                       # free reshape
    w_mat = jnp.transpose(weight, (0, 2, 3, 1)).reshape(cout, k_dim)
    b2 = bias.reshape(cout, 1)

    kernel = functools.partial(
        _conv_kernel, h=h, w=w, ksize=(kh_sz, kw_sz), stride=stride,
        padding=padding, oh=oh, ow=ow, wp=wp, out_len=out_len,
        cin=cin, cout=cout, apply_relu=apply_relu)

    # TODO(synk): at production sizes, add a 'parallel' OH-tile grid axis with
    # halo rows (keeps blocks inside v7x's 64 MiB VMEM and feeds both its TCs),
    # tile Cout (parallel) / Cin (arbitrary, innermost) with a VMEM f32
    # accumulator, set vmem_limit_bytes, and feed the MXU bf16 on v6e/v7x.
    out_flat = pl.pallas_call(
        kernel,
        out_shape=jax.ShapeDtypeStruct((n, cout, oh * ow), x_nchw.dtype),
        grid_spec=pltpu.PrefetchScalarGridSpec(
            num_scalar_prefetch=0,
            grid=(n,),
            in_specs=[
                pl.BlockSpec((1, cin, h * w), lambda b: (b, 0, 0)),
                pl.BlockSpec((cout, k_dim), lambda b: (0, 0)),
                pl.BlockSpec((cout, 1), lambda b: (0, 0)),
            ],
            out_specs=pl.BlockSpec((1, cout, oh * ow), lambda b: (b, 0, 0)),
            scratch_shapes=[
                pltpu.VMEM((cin, hp * wp), x_nchw.dtype),
                pltpu.VMEM((k_dim, out_len), x_nchw.dtype),
            ],
        ),
        compiler_params=pltpu.CompilerParams(
            dimension_semantics=("parallel",)),
    )(x_flat, w_mat, b2)

    # already NCHW order -> just split the flattened spatial dim (free).
    return out_flat.reshape(n, cout, oh, ow)


if __name__ == "__main__":
    # ConvBlock(in_channels=4, out_channels=8, ksize=3, stride=1, padding=1)
    N, CIN, H, W = 2, 4, 16, 16
    COUT, KSIZE, STRIDE, PADDING = 8, 3, 1, 1

    key = jax.random.PRNGKey(0)
    kx, kwt, kb = jax.random.split(key, 3)
    x = jax.random.normal(kx, (N, CIN, H, W), dtype=jnp.float32)
    # Deterministic synthetic parameters (shapes match nn.Conv2d(4, 8, 3)).
    fan_in = CIN * KSIZE * KSIZE
    bound = 1.0 / (fan_in ** 0.5)
    weight = jax.random.uniform(kwt, (COUT, CIN, KSIZE, KSIZE),
                                minval=-bound, maxval=bound,
                                dtype=jnp.float32)
    bias = jax.random.uniform(kb, (COUT,), minval=-bound, maxval=bound,
                              dtype=jnp.float32)

    out = conv_block_forward(x, weight, bias, stride=STRIDE, padding=PADDING)
    out = jax.block_until_ready(out)

    # Cross-check against XLA's conv (pure-JAX reference).
    ref = jax.lax.conv_general_dilated(
        x, weight, window_strides=(STRIDE, STRIDE),
        padding=((PADDING, PADDING), (PADDING, PADDING)),
        dimension_numbers=("NCHW", "OIHW", "NCHW"),
        precision=jax.lax.Precision.HIGHEST,
    ) + bias[None, :, None, None]
    assert out.shape == (N, COUT, H, W)
    assert jnp.allclose(out, ref, atol=1e-4, rtol=1e-4)

    print("KERNEL_OK")
</pallas_src>

<mosaic_0001>
module attributes {stable_mosaic.version = 11 : i64} {
  func.func @_conv_kernel(%arg0: i32, %arg1: memref<1x4x256xf32, #tpu.memory_space<vmem>>, %arg2: memref<8x36xf32, #tpu.memory_space<vmem>>, %arg3: memref<8x1xf32, #tpu.memory_space<vmem>>, %arg4: memref<1x8x256xf32, #tpu.memory_space<vmem>>, %arg5: memref<4x324xf32, #tpu.memory_space<vmem>>, %arg6: memref<36x286xf32, #tpu.memory_space<vmem>>) attributes {dimension_semantics = [#tpu.dimension_semantics<parallel>], iteration_bounds = array<i64: 2>, scalar_prefetch = 0 : i64, scratch_operands = 2 : i64, tpu.core_type = #tpu.core_type<tc>, window_params = [{transform_indices = @transform_0, window_bounds = array<i64: 1, 4, 256>}, {pipeline_mode = #tpu.pipeline_mode<synchronous>, transform_indices = @transform_1, window_bounds = array<i64: 8, 36>}, {pipeline_mode = #tpu.pipeline_mode<synchronous>, transform_indices = @transform_2, window_bounds = array<i64: 8, 1>}, {transform_indices = @transform_3, window_bounds = array<i64: 1, 8, 256>}]} {
    %cst = arith.constant 0.000000e+00 : f32
    %0 = vector.broadcast %cst : f32 to vector<4x324xf32>
    %c0 = arith.constant 0 : index
    %c0_0 = arith.constant 0 : index
    %1 = vector.load %arg5[%c0, %c0_0] : memref<4x324xf32, #tpu.memory_space<vmem>>, vector<4x324xf32>
    tpu.vector_store %arg5[%c0, %c0_0], %0 {strides = array<i32>} : memref<4x324xf32, #tpu.memory_space<vmem>>, vector<4x324xf32>,
    %c0_1 = arith.constant 0 : index
    %c0_2 = arith.constant 0 : index
    %c0_3 = arith.constant 0 : index
    %2 = vector.load %arg1[%c0_1, %c0_2, %c0_3] : memref<1x4x256xf32, #tpu.memory_space<vmem>>, vector<1x4x16xf32>
    %3 = vector.shape_cast %2 : vector<1x4x16xf32> to vector<4x16xf32>
    %c0_4 = arith.constant 0 : index
    %c19 = arith.constant 19 : index
    %4 = vector.load %arg5[%c0_4, %c19] : memref<4x324xf32, #tpu.memory_space<vmem>>, vector<4x16xf32>
    tpu.vector_store %arg5[%c0_4, %c19], %3 {strides = array<i32>} : memref<4x324xf32, #tpu.memory_space<vmem>>, vector<4x16xf32>,
    %c0_5 = arith.constant 0 : index
    %c0_6 = arith.constant 0 : index
    %c16 = arith.constant 16 : index
    %5 = vector.load %arg1[%c0_5, %c0_6, %c16] : memref<1x4x256xf32, #tpu.memory_space<vmem>>, vector<1x4x16xf32>
    %6 = vector.shape_cast %5 : vector<1x4x16xf32> to vector<4x16xf32>
    %c0_7 = arith.constant 0 : index
    %c37 = arith.constant 37 : index
    %7 = vector.load %arg5[%c0_7, %c37] : memref<4x324xf32, #tpu.memory_space<vmem>>, vector<4x16xf32>
    tpu.vector_store %arg5[%c0_7, %c37], %6 {strides = array<i32>} : memref<4x324xf32, #tpu.memory_space<vmem>>, vector<4x16xf32>,
    %c0_8 = arith.constant 0 : index
    %c0_9 = arith.constant 0 : index
    %c32 = arith.constant 32 : index
    %8 = vector.load %arg1[%c0_8, %c0_9, %c32] : memref<1x4x256xf32, #tpu.memory_space<vmem>>, vector<1x4x16xf32>
    %9 = vector.shape_cast %8 : vector<1x4x16xf32> to vector<4x16xf32>
    %c0_10 = arith.constant 0 : index
    %c55 = arith.constant 55 : index
    %10 = vector.load %arg5[%c0_10, %c55] : memref<4x324xf32, #tpu.memory_space<vmem>>, vector<4x16xf32>
    tpu.vector_store %arg5[%c0_10, %c55], %9 {strides = array<i32>} : memref<4x324xf32, #tpu.memory_space<vmem>>, vector<4x16xf32>,
    %c0_11 = arith.constant 0 : index
    %c0_12 = arith.constant 0 : index
    %c48 = arith.constant 48 : index
    %11 = vector.load %arg1[%c0_11, %c0_12, %c48] : memref<1x4x256xf32, #tpu.memory_space<vmem>>, vector<1x4x16xf32>
    %12 = vector.shape_cast %11 : vector<1x4x16xf32> to vector<4x16xf32>
    %c0_13 = arith.constant 0 : index
    %c73 = arith.constant 73 : index
    %13 = vector.load %arg5[%c0_13, %c73] : memref<4x324xf32, #tpu.memory_space<vmem>>, vector<4x16xf32>
    tpu.vector_store %arg5[%c0_13, %c73], %12 {strides = array<i32>} : memref<4x324xf32, #tpu.memory_space<vmem>>, vector<4x16xf32>,
    %c0_14 = arith.constant 0 : index
    %c0_15 = arith.constant 0 : index
    %c64 = arith.constant 64 : index
    %14 = vector.load %arg1[%c0_14, %c0_15, %c64] : memref<1x4x256xf32, #tpu.memory_space<vmem>>, vector<1x4x16xf32>
    %15 = vector.shape_cast %14 : vector<1x4x16xf32> to vector<4x16xf32>
    %c0_16 = arith.constant 0 : index
    %c91 = arith.constant 91 : index
    %16 = vector.load %arg5[%c0_16, %c91] : memref<4x324xf32, #tpu.memory_space<vmem>>, vector<4x16xf32>
    tpu.vector_store %arg5[%c0_16, %c91], %15 {strides = array<i32>} : memref<4x324xf32, #tpu.memory_space<vmem>>, vector<4x16xf32>,
    %c0_17 = arith.constant 0 : index
    %c0_18 = arith.constant 0 : index
    %c80 = arith.constant 80 : index
    %17 = vector.load %arg1[%c0_17, %c0_18, %c80] : memref<1x4x256xf32, #tpu.memory_space<vmem>>, vector<1x4x16xf32>
    %18 = vector.shape_cast %17 : vector<1x4x16xf32> to vector<4x16xf32>
    %c0_19 = arith.constant 0 : index
    %c109 = arith.constant 109 : index
    %19 = vector.load %arg5[%c0_19, %c109] : memref<4x324xf32, #tpu.memory_space<vmem>>, vector<4x16xf32>
    tpu.vector_store %arg5[%c0_19, %c109], %18 {strides = array<i32>} : memref<4x324xf32, #tpu.memory_space<vmem>>, vector<4x16xf32>,
    %c0_20 = arith.constant 0 : index
    %c0_21 = arith.constant 0 : index
    %c96 = arith.constant 96 : index
    %20 = vector.load %arg1[%c0_20, %c0_21, %c96] : memref<1x4x256xf32, #tpu.memory_space<vmem>>, vector<1x4x16xf32>
    %21 = vector.shape_cast %20 : vector<1x4x16xf32> to vector<4x16xf32>
    %c0_22 = arith.constant 0 : index
    %c127 = arith.constant 127 : index
    %22 = vector.load %arg5[%c0_22, %c127] : memref<4x324xf32, #tpu.memory_space<vmem>>, vector<4x16xf32>
    tpu.vector_store %arg5[%c0_22, %c127], %21 {strides = array<i32>} : memref<4x324xf32, #tpu.memory_space<vmem>>, vector<4x16xf32>,
    %c0_23 = arith.constant 0 : index
    %c0_24 = arith.constant 0 : index
    %c112 = arith.constant 112 : index
    %23 = vector.load %arg1[%c0_23, %c0_24, %c112] : memref<1x4x256xf32, #tpu.memory_space<vmem>>, vector<1x4x16xf32>
    %24 = vector.shape_cast %23 : vector<1x4x16xf32> to vector<4x16xf32>
    %c0_25 = arith.constant 0 : index
    %c145 = arith.constant 145 : index
    %25 = vector.load %arg5[%c0_25, %c145] : memref<4x324xf32, #tpu.memory_space<vmem>>, vector<4x16xf32>
    tpu.vector_store %arg5[%c0_25, %c145], %24 {strides = array<i32>} : memref<4x324xf32, #tpu.memory_space<vmem>>, vector<4x16xf32>,
    %c0_26 = arith.constant 0 : index
    %c0_27 = arith.constant 0 : index
    %c128 = arith.constant 128 : index
    %26 = vector.load %arg1[%c0_26, %c0_27, %c128] : memref<1x4x256xf32, #tpu.memory_space<vmem>>, vector<1x4x16xf32>
    %27 = vector.shape_cast %26 : vector<1x4x16xf32> to vector<4x16xf32>
    %c0_28 = arith.constant 0 : index
    %c163 = arith.constant 163 : index
    %28 = vector.load %arg5[%c0_28, %c163] : memref<4x324xf32, #tpu.memory_space<vmem>>, vector<4x16xf32>
    tpu.vector_store %arg5[%c0_28, %c163], %27 {strides = array<i32>} : memref<4x324xf32, #tpu.memory_space<vmem>>, vector<4x16xf32>,
    %c0_29 = arith.constant 0 : index
    %c0_30 = arith.constant 0 : index
    %c144 = arith.constant 144 : index
    %29 = vector.load %arg1[%c0_29, %c0_30, %c144] : memref<1x4x256xf32, #tpu.memory_space<vmem>>, vector<1x4x16xf32>
    %30 = vector.shape_cast %29 : vector<1x4x16xf32> to vector<4x16xf32>
    %c0_31 = arith.constant 0 : index
    %c181 = arith.constant 181 : index
    %31 = vector.load %arg5[%c0_31, %c181] : memref<4x324xf32, #tpu.memory_space<vmem>>, vector<4x16xf32>
    tpu.vector_store %arg5[%c0_31, %c181], %30 {strides = array<i32>} : memref<4x324xf32, #tpu.memory_space<vmem>>, vector<4x16xf32>,
    %c0_32 = arith.constant 0 : index
    %c0_33 = arith.constant 0 : index
    %c160 = arith.constant 160 : index
    %32 = vector.load %arg1[%c0_32, %c0_33, %c160] : memref<1x4x256xf32, #tpu.memory_space<vmem>>, vector<1x4x16xf32>
    %33 = vector.shape_cast %32 : vector<1x4x16xf32> to vector<4x16xf32>
    %c0_34 = arith.constant 0 : index
    %c199 = arith.constant 199 : index
    %34 = vector.load %arg5[%c0_34, %c199] : memref<4x324xf32, #tpu.memory_space<vmem>>, vector<4x16xf32>
    tpu.vector_store %arg5[%c0_34, %c199], %33 {strides = array<i32>} : memref<4x324xf32, #tpu.memory_space<vmem>>, vector<4x16xf32>,
    %c0_35 = arith.constant 0 : index
    %c0_36 = arith.constant 0 : index
    %c176 = arith.constant 176 : index
    %35 = vector.load %arg1[%c0_35, %c0_36, %c176] : memref<1x4x256xf32, #tpu.memory_space<vmem>>, vector<1x4x16xf32>
    %36 = vector.shape_cast %35 : vector<1x4x16xf32> to vector<4x16xf32>
    %c0_37 = arith.constant 0 : index
    %c217 = arith.constant 217 : index
    %37 = vector.load %arg5[%c0_37, %c217] : memref<4x324xf32, #tpu.memory_space<vmem>>, vector<4x16xf32>
    tpu.vector_store %arg5[%c0_37, %c217], %36 {strides = array<i32>} : memref<4x324xf32, #tpu.memory_space<vmem>>, vector<4x16xf32>,
    %c0_38 = arith.constant 0 : index
    %c0_39 = arith.constant 0 : index
    %c192 = arith.constant 192 : index
    %38 = vector.load %arg1[%c0_38, %c0_39, %c192] : memref<1x4x256xf32, #tpu.memory_space<vmem>>, vector<1x4x16xf32>
    %39 = vector.shape_cast %38 : vector<1x4x16xf32> to vector<4x16xf32>
    %c0_40 = arith.constant 0 : index
    %c235 = arith.constant 235 : index
    %40 = vector.load %arg5[%c0_40, %c235] : memref<4x324xf32, #tpu.memory_space<vmem>>, vector<4x16xf32>
    tpu.vector_store %arg5[%c0_40, %c235], %39 {strides = array<i32>} : memref<4x324xf32, #tpu.memory_space<vmem>>, vector<4x16xf32>,
    %c0_41 = arith.constant 0 : index
    %c0_42 = arith.constant 0 : index
    %c208 = arith.constant 208 : index
    %41 = vector.load %arg1[%c0_41, %c0_42, %c208] : memref<1x4x256xf32, #tpu.memory_space<vmem>>, vector<1x4x16xf32>
    %42 = vector.shape_cast %41 : vector<1x4x16xf32> to vector<4x16xf32>
    %c0_43 = arith.constant 0 : index
    %c253 = arith.constant 253 : index
    %43 = vector.load %arg5[%c0_43, %c253] : memref<4x324xf32, #tpu.memory_space<vmem>>, vector<4x16xf32>
    tpu.vector_store %arg5[%c0_43, %c253], %42 {strides = array<i32>} : memref<4x324xf32, #tpu.memory_space<vmem>>, vector<4x16xf32>,
    %c0_44 = arith.constant 0 : index
    %c0_45 = arith.constant 0 : index
    %c224 = arith.constant 224 : index
    %44 = vector.load %arg1[%c0_44, %c0_45, %c224] : memref<1x4x256xf32, #tpu.memory_space<vmem>>, vector<1x4x16xf32>
    %45 = vector.shape_cast %44 : vector<1x4x16xf32> to vector<4x16xf32>
    %c0_46 = arith.constant 0 : index
    %c271 = arith.constant 271 : index
    %46 = vector.load %arg5[%c0_46, %c271] : memref<4x324xf32, #tpu.memory_space<vmem>>, vector<4x16xf32>
    tpu.vector_store %arg5[%c0_46, %c271], %45 {strides = array<i32>} : memref<4x324xf32, #tpu.memory_space<vmem>>, vector<4x16xf32>,
    %c0_47 = arith.constant 0 : index
    %c0_48 = arith.constant 0 : index
    %c240 = arith.constant 240 : index
    %47 = vector.load %arg1[%c0_47, %c0_48, %c240] : memref<1x4x256xf32, #tpu.memory_space<vmem>>, vector<1x4x16xf32>
    %48 = vector.shape_cast %47 : vector<1x4x16xf32> to vector<4x16xf32>
    %c0_49 = arith.constant 0 : index
    %c289 = arith.constant 289 : index
    %49 = vector.load %arg5[%c0_49, %c289] : memref<4x324xf32, #tpu.memory_space<vmem>>, vector<4x16xf32>
    tpu.vector_store %arg5[%c0_49, %c289], %48 {strides = array<i32>} : memref<4x324xf32, #tpu.memory_space<vmem>>, vector<4x16xf32>,
    %c0_50 = arith.constant 0 : index
    %c0_51 = arith.constant 0 : index
    %50 = vector.load %arg5[%c0_50, %c0_51] : memref<4x324xf32, #tpu.memory_space<vmem>>, vector<4x286xf32>
    %c0_52 = arith.constant 0 : index
    %c0_53 = arith.constant 0 : index
    %51 = vector.load %arg6[%c0_52, %c0_53] : memref<36x286xf32, #tpu.memory_space<vmem>>, vector<4x286xf32>
    tpu.vector_store %arg6[%c0_52, %c0_53], %50 {strides = array<i32>} : memref<36x286xf32, #tpu.memory_space<vmem>>, vector<4x286xf32>,
    %c0_54 = arith.constant 0 : index
    %c1 = arith.constant 1 : index
    %52 = vector.load %arg5[%c0_54, %c1] : memref<4x324xf32, #tpu.memory_space<vmem>>, vector<4x286xf32>
    %c4 = arith.constant 4 : index
    %c0_55 = arith.constant 0 : index
    %53 = vector.load %arg6[%c4, %c0_55] : memref<36x286xf32, #tpu.memory_space<vmem>>, vector<4x286xf32>
    tpu.vector_store %arg6[%c4, %c0_55], %52 {strides = array<i32>} : memref<36x286xf32, #tpu.memory_space<vmem>>, vector<4x286xf32>,
    %c0_56 = arith.constant 0 : index
    %c2 = arith.constant 2 : index
    %54 = vector.load %arg5[%c0_56, %c2] : memref<4x324xf32, #tpu.memory_space<vmem>>, vector<4x286xf32>
    %c8 = arith.constant 8 : index
    %c0_57 = arith.constant 0 : index
    %55 = vector.load %arg6[%c8, %c0_57] : memref<36x286xf32, #tpu.memory_space<vmem>>, vector<4x286xf32>
    tpu.vector_store %arg6[%c8, %c0_57], %54 {strides = array<i32>} : memref<36x286xf32, #tpu.memory_space<vmem>>, vector<4x286xf32>,
    %c0_58 = arith.constant 0 : index
    %c18 = arith.constant 18 : index
    %56 = vector.load %arg5[%c0_58, %c18] : memref<4x324xf32, #tpu.memory_space<vmem>>, vector<4x286xf32>
    %c12 = arith.constant 12 : index
    %c0_59 = arith.constant 0 : index
    %57 = vector.load %arg6[%c12, %c0_59] : memref<36x286xf32, #tpu.memory_space<vmem>>, vector<4x286xf32>
    tpu.vector_store %arg6[%c12, %c0_59], %56 {strides = array<i32>} : memref<36x286xf32, #tpu.memory_space<vmem>>, vector<4x286xf32>,
    %c0_60 = arith.constant 0 : index
    %c19_61 = arith.constant 19 : index
    %58 = vector.load %arg5[%c0_60, %c19_61] : memref<4x324xf32, #tpu.memory_space<vmem>>, vector<4x286xf32>
    %c16_62 = arith.constant 16 : index
    %c0_63 = arith.constant 0 : index
    %59 = vector.load %arg6[%c16_62, %c0_63] : memref<36x286xf32, #tpu.memory_space<vmem>>, vector<4x286xf32>
    tpu.vector_store %arg6[%c16_62, %c0_63], %58 {strides = array<i32>} : memref<36x286xf32, #tpu.memory_space<vmem>>, vector<4x286xf32>,
    %c0_64 = arith.constant 0 : index
    %c20 = arith.constant 20 : index
    %60 = vector.load %arg5[%c0_64, %c20] : memref<4x324xf32, #tpu.memory_space<vmem>>, vector<4x286xf32>
    %c20_65 = arith.constant 20 : index
    %c0_66 = arith.constant 0 : index
    %61 = vector.load %arg6[%c20_65, %c0_66] : memref<36x286xf32, #tpu.memory_space<vmem>>, vector<4x286xf32>
    tpu.vector_store %arg6[%c20_65, %c0_66], %60 {strides = array<i32>} : memref<36x286xf32, #tpu.memory_space<vmem>>, vector<4x286xf32>,
    %c0_67 = arith.constant 0 : index
    %c36 = arith.constant 36 : index
    %62 = vector.load %arg5[%c0_67, %c36] : memref<4x324xf32, #tpu.memory_space<vmem>>, vector<4x286xf32>
    %c24 = arith.constant 24 : index
    %c0_68 = arith.constant 0 : index
    %63 = vector.load %arg6[%c24, %c0_68] : memref<36x286xf32, #tpu.memory_space<vmem>>, vector<4x286xf32>
    tpu.vector_store %arg6[%c24, %c0_68], %62 {strides = array<i32>} : memref<36x286xf32, #tpu.memory_space<vmem>>, vector<4x286xf32>,
    %c0_69 = arith.constant 0 : index
    %c37_70 = arith.constant 37 : index
    %64 = vector.load %arg5[%c0_69, %c37_70] : memref<4x324xf32, #tpu.memory_space<vmem>>, vector<4x286xf32>
    %c28 = arith.constant 28 : index
    %c0_71 = arith.constant 0 : index
    %65 = vector.load %arg6[%c28, %c0_71] : memref<36x286xf32, #tpu.memory_space<vmem>>, vector<4x286xf32>
    tpu.vector_store %arg6[%c28, %c0_71], %64 {strides = array<i32>} : memref<36x286xf32, #tpu.memory_space<vmem>>, vector<4x286xf32>,
    %c0_72 = arith.constant 0 : index
    %c38 = arith.constant 38 : index
    %66 = vector.load %arg5[%c0_72, %c38] : memref<4x324xf32, #tpu.memory_space<vmem>>, vector<4x286xf32>
    %c32_73 = arith.constant 32 : index
    %c0_74 = arith.constant 0 : index
    %67 = vector.load %arg6[%c32_73, %c0_74] : memref<36x286xf32, #tpu.memory_space<vmem>>, vector<4x286xf32>
    tpu.vector_store %arg6[%c32_73, %c0_74], %66 {strides = array<i32>} : memref<36x286xf32, #tpu.memory_space<vmem>>, vector<4x286xf32>,
    %c0_75 = arith.constant 0 : index
    %c0_76 = arith.constant 0 : index
    %68 = vector.load %arg2[%c0_75, %c0_76] : memref<8x36xf32, #tpu.memory_space<vmem>>, vector<8x36xf32>
    %c0_77 = arith.constant 0 : index
    %c0_78 = arith.constant 0 : index
    %69 = vector.load %arg6[%c0_77, %c0_78] : memref<36x286xf32, #tpu.memory_space<vmem>>, vector<36x286xf32>
    %cst_79 = arith.constant dense<0.000000e+00> : vector<8x286xf32>
    %70 = tpu.matmul %68, %69, %cst_79 {dimension_numbers = #tpu.dot_dimension_numbers<[1], [0], [0], [1], [0, 0, 1, 1], [], []>} : vector<8x36xf32>, vector<36x286xf32>, vector<8x286xf32> -> vector<8x286xf32>
    %c0_80 = arith.constant 0 : index
    %c0_81 = arith.constant 0 : index
    %71 = vector.load %arg3[%c0_80, %c0_81] : memref<8x1xf32, #tpu.memory_space<vmem>>, vector<8x1xf32>
    %72 = vector.broadcast %71 : vector<8x1xf32> to vector<8x286xf32>
    %73 = arith.addf %70, %72 : vector<8x286xf32>
    %74 = vector.extract_strided_slice %73 {offsets = [0, 0], sizes = [8, 16], strides = [1, 1]} : vector<8x286xf32> to vector<8x16xf32>
    %c0_82 = arith.constant 0 : index
    %c0_83 = arith.constant 0 : index
    %c0_84 = arith.constant 0 : index
    %75 = vector.load %arg4[%c0_82, %c0_83, %c0_84] : memref<1x8x256xf32, #tpu.memory_space<vmem>>, vector<1x8x16xf32>
    %76 = vector.shape_cast %75 : vector<1x8x16xf32> to vector<8x16xf32>
    %77 = vector.shape_cast %74 : vector<8x16xf32> to vector<1x8x16xf32>
    tpu.vector_store %arg4[%c0_82, %c0_83, %c0_84], %77 {strides = array<i32>} : memref<1x8x256xf32, #tpu.memory_space<vmem>>, vector<1x8x16xf32>,
    %78 = vector.extract_strided_slice %73 {offsets = [0, 18], sizes = [8, 16], strides = [1, 1]} : vector<8x286xf32> to vector<8x16xf32>
    %c0_85 = arith.constant 0 : index
    %c0_86 = arith.constant 0 : index
    %c16_87 = arith.constant 16 : index
    %79 = vector.load %arg4[%c0_85, %c0_86, %c16_87] : memref<1x8x256xf32, #tpu.memory_space<vmem>>, vector<1x8x16xf32>
    %80 = vector.shape_cast %79 : vector<1x8x16xf32> to vector<8x16xf32>
    %81 = vector.shape_cast %78 : vector<8x16xf32> to vector<1x8x16xf32>
    tpu.vector_store %arg4[%c0_85, %c0_86, %c16_87], %81 {strides = array<i32>} : memref<1x8x256xf32, #tpu.memory_space<vmem>>, vector<1x8x16xf32>,
    %82 = vector.extract_strided_slice %73 {offsets = [0, 36], sizes = [8, 16], strides = [1, 1]} : vector<8x286xf32> to vector<8x16xf32>
    %c0_88 = arith.constant 0 : index
    %c0_89 = arith.constant 0 : index
    %c32_90 = arith.constant 32 : index
    %83 = vector.load %arg4[%c0_88, %c0_89, %c32_90] : memref<1x8x256xf32, #tpu.memory_space<vmem>>, vector<1x8x16xf32>
    %84 = vector.shape_cast %83 : vector<1x8x16xf32> to vector<8x16xf32>
    %85 = vector.shape_cast %82 : vector<8x16xf32> to vector<1x8x16xf32>
    tpu.vector_store %arg4[%c0_88, %c0_89, %c32_90], %85 {strides = array<i32>} : memref<1x8x256xf32, #tpu.memory_space<vmem>>, vector<1x8x16xf32>,
    %86 = vector.extract_strided_slice %73 {offsets = [0, 54], sizes = [8, 16], strides = [1, 1]} : vector<8x286xf32> to vector<8x16xf32>
    %c0_91 = arith.constant 0 : index
    %c0_92 = arith.constant 0 : index
    %c48_93 = arith.constant 48 : index
    %87 = vector.load %arg4[%c0_91, %c0_92, %c48_93] : memref<1x8x256xf32, #tpu.memory_space<vmem>>, vector<1x8x16xf32>
    %88 = vector.shape_cast %87 : vector<1x8x16xf32> to vector<8x16xf32>
    %89 = vector.shape_cast %86 : vector<8x16xf32> to vector<1x8x16xf32>
    tpu.vector_store %arg4[%c0_91, %c0_92, %c48_93], %89 {strides = array<i32>} : memref<1x8x256xf32, #tpu.memory_space<vmem>>, vector<1x8x16xf32>,
    %90 = vector.extract_strided_slice %73 {offsets = [0, 72], sizes = [8, 16], strides = [1, 1]} : vector<8x286xf32> to vector<8x16xf32>
    %c0_94 = arith.constant 0 : index
    %c0_95 = arith.constant 0 : index
    %c64_96 = arith.constant 64 : index
    %91 = vector.load %arg4[%c0_94, %c0_95, %c64_96] : memref<1x8x256xf32, #tpu.memory_space<vmem>>, vector<1x8x16xf32>
    %92 = vector.shape_cast %91 : vector<1x8x16xf32> to vector<8x16xf32>
    %93 = vector.shape_cast %90 : vector<8x16xf32> to vector<1x8x16xf32>
    tpu.vector_store %arg4[%c0_94, %c0_95, %c64_96], %93 {strides = array<i32>} : memref<1x8x256xf32, #tpu.memory_space<vmem>>, vector<1x8x16xf32>,
    %94 = vector.extract_strided_slice %73 {offsets = [0, 90], sizes = [8, 16], strides = [1, 1]} : vector<8x286xf32> to vector<8x16xf32>
    %c0_97 = arith.constant 0 : index
    %c0_98 = arith.constant 0 : index
    %c80_99 = arith.constant 80 : index
    %95 = vector.load %arg4[%c0_97, %c0_98, %c80_99] : memref<1x8x256xf32, #tpu.memory_space<vmem>>, vector<1x8x16xf32>
    %96 = vector.shape_cast %95 : vector<1x8x16xf32> to vector<8x16xf32>
    %97 = vector.shape_cast %94 : vector<8x16xf32> to vector<1x8x16xf32>
    tpu.vector_store %arg4[%c0_97, %c0_98, %c80_99], %97 {strides = array<i32>} : memref<1x8x256xf32, #tpu.memory_space<vmem>>, vector<1x8x16xf32>,
    %98 = vector.extract_strided_slice %73 {offsets = [0, 108], sizes = [8, 16], strides = [1, 1]} : vector<8x286xf32> to vector<8x16xf32>
    %c0_100 = arith.constant 0 : index
    %c0_101 = arith.constant 0 : index
    %c96_102 = arith.constant 96 : index
    %99 = vector.load %arg4[%c0_100, %c0_101, %c96_102] : memref<1x8x256xf32, #tpu.memory_space<vmem>>, vector<1x8x16xf32>
    %100 = vector.shape_cast %99 : vector<1x8x16xf32> to vector<8x16xf32>
    %101 = vector.shape_cast %98 : vector<8x16xf32> to vector<1x8x16xf32>
    tpu.vector_store %arg4[%c0_100, %c0_101, %c96_102], %101 {strides = array<i32>} : memref<1x8x256xf32, #tpu.memory_space<vmem>>, vector<1x8x16xf32>,
    %102 = vector.extract_strided_slice %73 {offsets = [0, 126], sizes = [8, 16], strides = [1, 1]} : vector<8x286xf32> to vector<8x16xf32>
    %c0_103 = arith.constant 0 : index
    %c0_104 = arith.constant 0 : index
    %c112_105 = arith.constant 112 : index
    %103 = vector.load %arg4[%c0_103, %c0_104, %c112_105] : memref<1x8x256xf32, #tpu.memory_space<vmem>>, vector<1x8x16xf32>
    %104 = vector.shape_cast %103 : vector<1x8x16xf32> to vector<8x16xf32>
    %105 = vector.shape_cast %102 : vector<8x16xf32> to vector<1x8x16xf32>
    tpu.vector_store %arg4[%c0_103, %c0_104, %c112_105], %105 {strides = array<i32>} : memref<1x8x256xf32, #tpu.memory_space<vmem>>, vector<1x8x16xf32>,
    %106 = vector.extract_strided_slice %73 {offsets = [0, 144], sizes = [8, 16], strides = [1, 1]} : vector<8x286xf32> to vector<8x16xf32>
    %c0_106 = arith.constant 0 : index
    %c0_107 = arith.constant 0 : index
    %c128_108 = arith.constant 128 : index
    %107 = vector.load %arg4[%c0_106, %c0_107, %c128_108] : memref<1x8x256xf32, #tpu.memory_space<vmem>>, vector<1x8x16xf32>
    %108 = vector.shape_cast %107 : vector<1x8x16xf32> to vector<8x16xf32>
    %109 = vector.shape_cast %106 : vector<8x16xf32> to vector<1x8x16xf32>
    tpu.vector_store %arg4[%c0_106, %c0_107, %c128_108], %109 {strides = array<i32>} : memref<1x8x256xf32, #tpu.memory_space<vmem>>, vector<1x8x16xf32>,
    %110 = vector.extract_strided_slice %73 {offsets = [0, 162], sizes = [8, 16], strides = [1, 1]} : vector<8x286xf32> to vector<8x16xf32>
    %c0_109 = arith.constant 0 : index
    %c0_110 = arith.constant 0 : index
    %c144_111 = arith.constant 144 : index
    %111 = vector.load %arg4[%c0_109, %c0_110, %c144_111] : memref<1x8x256xf32, #tpu.memory_space<vmem>>, vector<1x8x16xf32>
    %112 = vector.shape_cast %111 : vector<1x8x16xf32> to vector<8x16xf32>
    %113 = vector.shape_cast %110 : vector<8x16xf32> to vector<1x8x16xf32>
    tpu.vector_store %arg4[%c0_109, %c0_110, %c144_111], %113 {strides = array<i32>} : memref<1x8x256xf32, #tpu.memory_space<vmem>>, vector<1x8x16xf32>,
    %114 = vector.extract_strided_slice %73 {offsets = [0, 180], sizes = [8, 16], strides = [1, 1]} : vector<8x286xf32> to vector<8x16xf32>
    %c0_112 = arith.constant 0 : index
    %c0_113 = arith.constant 0 : index
    %c160_114 = arith.constant 160 : index
    %115 = vector.load %arg4[%c0_112, %c0_113, %c160_114] : memref<1x8x256xf32, #tpu.memory_space<vmem>>, vector<1x8x16xf32>
    %116 = vector.shape_cast %115 : vector<1x8x16xf32> to vector<8x16xf32>
    %117 = vector.shape_cast %114 : vector<8x16xf32> to vector<1x8x16xf32>
    tpu.vector_store %arg4[%c0_112, %c0_113, %c160_114], %117 {strides = array<i32>} : memref<1x8x256xf32, #tpu.memory_space<vmem>>, vector<1x8x16xf32>,
    %118 = vector.extract_strided_slice %73 {offsets = [0, 198], sizes = [8, 16], strides = [1, 1]} : vector<8x286xf32> to vector<8x16xf32>
    %c0_115 = arith.constant 0 : index
    %c0_116 = arith.constant 0 : index
    %c176_117 = arith.constant 176 : index
    %119 = vector.load %arg4[%c0_115, %c0_116, %c176_117] : memref<1x8x256xf32, #tpu.memory_space<vmem>>, vector<1x8x16xf32>
    %120 = vector.shape_cast %119 : vector<1x8x16xf32> to vector<8x16xf32>
    %121 = vector.shape_cast %118 : vector<8x16xf32> to vector<1x8x16xf32>
    tpu.vector_store %arg4[%c0_115, %c0_116, %c176_117], %121 {strides = array<i32>} : memref<1x8x256xf32, #tpu.memory_space<vmem>>, vector<1x8x16xf32>,
    %122 = vector.extract_strided_slice %73 {offsets = [0, 216], sizes = [8, 16], strides = [1, 1]} : vector<8x286xf32> to vector<8x16xf32>
    %c0_118 = arith.constant 0 : index
    %c0_119 = arith.constant 0 : index
    %c192_120 = arith.constant 192 : index
    %123 = vector.load %arg4[%c0_118, %c0_119, %c192_120] : memref<1x8x256xf32, #tpu.memory_space<vmem>>, vector<1x8x16xf32>
    %124 = vector.shape_cast %123 : vector<1x8x16xf32> to vector<8x16xf32>
    %125 = vector.shape_cast %122 : vector<8x16xf32> to vector<1x8x16xf32>
    tpu.vector_store %arg4[%c0_118, %c0_119, %c192_120], %125 {strides = array<i32>} : memref<1x8x256xf32, #tpu.memory_space<vmem>>, vector<1x8x16xf32>,
    %126 = vector.extract_strided_slice %73 {offsets = [0, 234], sizes = [8, 16], strides = [1, 1]} : vector<8x286xf32> to vector<8x16xf32>
    %c0_121 = arith.constant 0 : index
    %c0_122 = arith.constant 0 : index
    %c208_123 = arith.constant 208 : index
    %127 = vector.load %arg4[%c0_121, %c0_122, %c208_123] : memref<1x8x256xf32, #tpu.memory_space<vmem>>, vector<1x8x16xf32>
    %128 = vector.shape_cast %127 : vector<1x8x16xf32> to vector<8x16xf32>
    %129 = vector.shape_cast %126 : vector<8x16xf32> to vector<1x8x16xf32>
    tpu.vector_store %arg4[%c0_121, %c0_122, %c208_123], %129 {strides = array<i32>} : memref<1x8x256xf32, #tpu.memory_space<vmem>>, vector<1x8x16xf32>,
    %130 = vector.extract_strided_slice %73 {offsets = [0, 252], sizes = [8, 16], strides = [1, 1]} : vector<8x286xf32> to vector<8x16xf32>
    %c0_124 = arith.constant 0 : index
    %c0_125 = arith.constant 0 : index
    %c224_126 = arith.constant 224 : index
    %131 = vector.load %arg4[%c0_124, %c0_125, %c224_126] : memref<1x8x256xf32, #tpu.memory_space<vmem>>, vector<1x8x16xf32>
    %132 = vector.shape_cast %131 : vector<1x8x16xf32> to vector<8x16xf32>
    %133 = vector.shape_cast %130 : vector<8x16xf32> to vector<1x8x16xf32>
    tpu.vector_store %arg4[%c0_124, %c0_125, %c224_126], %133 {strides = array<i32>} : memref<1x8x256xf32, #tpu.memory_space<vmem>>, vector<1x8x16xf32>,
    %134 = vector.extract_strided_slice %73 {offsets = [0, 270], sizes = [8, 16], strides = [1, 1]} : vector<8x286xf32> to vector<8x16xf32>
    %c0_127 = arith.constant 0 : index
    %c0_128 = arith.constant 0 : index
    %c240_129 = arith.constant 240 : index
    %135 = vector.load %arg4[%c0_127, %c0_128, %c240_129] : memref<1x8x256xf32, #tpu.memory_space<vmem>>, vector<1x8x16xf32>
    %136 = vector.shape_cast %135 : vector<1x8x16xf32> to vector<8x16xf32>
    %137 = vector.shape_cast %134 : vector<8x16xf32> to vector<1x8x16xf32>
    tpu.vector_store %arg4[%c0_127, %c0_128, %c240_129], %137 {strides = array<i32>} : memref<1x8x256xf32, #tpu.memory_space<vmem>>, vector<1x8x16xf32>,
    return
  }
  func.func @transform_0(%arg0: i32) -> (i32, i32, i32) {
    %c0_i32 = arith.constant 0 : i32
    %c0_i32_0 = arith.constant 0 : i32
    %c0_i32_1 = arith.constant 0 : i32
    return %arg0, %c0_i32, %c0_i32_0 : i32, i32, i32
  }
  func.func @transform_1(%arg0: i32) -> (i32, i32) {
    %c0_i32 = arith.constant 0 : i32
    %c0_i32_0 = arith.constant 0 : i32
    %c0_i32_1 = arith.constant 0 : i32
    return %c0_i32, %c0_i32_0 : i32, i32
  }
  func.func @transform_2(%arg0: i32) -> (i32, i32) {
    %c0_i32 = arith.constant 0 : i32
    %c0_i32_0 = arith.constant 0 : i32
    %c0_i32_1 = arith.constant 0 : i32
    return %c0_i32, %c0_i32_0 : i32, i32
  }
  func.func @transform_3(%arg0: i32) -> (i32, i32, i32) {
    %c0_i32 = arith.constant 0 : i32
    %c0_i32_0 = arith.constant 0 : i32
    %c0_i32_1 = arith.constant 0 : i32
    return %arg0, %c0_i32, %c0_i32_0 : i32, i32, i32
  }
}

</mosaic_0001>

<bundles_post_ra>
// kernel: tpu_custom_call.1
= control target key start
LH: loop header
LB: loop body
LE: loop exit
PB: predicated region body
PF: predicated region fallthrough
CT: control target
= control target key end

     0   :  { %8 = vsyncpa [#allocation5], 0  ;;  %s1396_s0 = inlined_call_operand.hbm [shape: f32[2,4,256], index: 0, kind: input, shape index: {}]   ;;  %s1397_s1 = inlined_call_operand.vmem [shape: f32[8,36], index: 1, kind: input, shape index: {}]   ;;  %s1398_s2 = inlined_call_operand.vmem [shape: f32[8,1], index: 2, kind: input, shape index: {}]   ;;  %s1399_s3 = inlined_call_operand.hbm [shape: f32[2,8,256], index: 3, kind: output, shape index: {}]  }
   0x1   :  { %10 = vsyncpa [#allocation5 + $0x1], 0 }
   0x2   :  { %11 = vsyncpa [#allocation6], 0 }
   0x3   :  { %13 = vsyncpa [#allocation6 + $0x1], 0  ;;  %s1135_s12 = smov 0   ;;  %s1137_s13 = smov 0  }
   0x4   :  { %s1139_s14 = smov 0   ;;  %s1141_s15 = smov 0  }
   0x5 LB: > { %s1156_s16 = sadd.s32 4294967295, %s1071_s15   ;;  %s828_s17 = sadd.s32 4294967294, %s1071_s15   ;;  %s1071_s15 = sphi %s1141_s15, %s1414_s15   ;;  %s1067_s14 = sphi %s1139_s14, %s1413_s14   ;;  %s1063_s13 = sphi %s1137_s13, %s1412_s13   ;;  %s1059_s12 = sphi %s1135_s12, %s1411_s12  }
   0x6   : > { %s1160_s18 = sadd.s32 1, %s1071_s15   ;;  %s26_s19 = sadd.s32 1, %s1067_s14 }
   0x7   : > { %s23_s20 = ssub.s32 %s1071_s15, %s1160_s18  ;;  %p33_p0 = scmp.ne.s32.totalorder %s1067_s14, %s1063_s13 }
   0x8   : > { %p24_p1 = scmp.eq.s32.totalorder %s23_s20, 0  ;;  %p34_p2 = scmp.eq.s32.totalorder %s1071_s15, 0 }
   0x9   : > { %p39_p3 = scmp.ne.s32.totalorder %s1063_s13, %s1059_s12  ;;  %p40_p4 = scmp.eq.s32.totalorder %s1156_s16, 0 }
   0xa   : > { %s1172_s21 = scalar_select %p24_p1, %s1067_s14, %s26_s19  }
   0xb   : > { %p1174_p5 = por %p34_p2, %p33_p0  ;;  %p1178_p6 = por %p40_p4, %p39_p3 }
   0xc   : > { %p105_p7 = scmp.eq.s32.totalorder %s1156_s16, 1  ;;  %p111_p8 = scmp.eq.s32.totalorder %s828_s17, 1 }
   0xd   : > { %p894_p10 = scmp.lt.s32.totalorder %s1071_s15, 2  ;;  %s137_s26 = sand.u32 1, %s1067_s14  }
   0xe   : > { %p1185_p11 = por %p105_p7, %p33_p0  ;;  %p1189_p12 = por %p111_p8, %p39_p3 }
   0xf   : > { %s847_s27 = sshll.u32 %s1071_s15, 7  ;;  %s831_s28 = sshll.u32 %s137_s26, 3 }
  0x10   : > { %s1403_s24 = scalar_select %p1185_p11, 1, 0 }
  0x11   : > { %s1404_s25 = scalar_select %p1189_p12, 1, 0 }
  0x12   : > { %s1198_s4 = scalar_lea.hbm %s1396_s0, %s847_s27  ;;  %s141_s5 = scalar_lea.vmem [#allocation4], %s831_s28 }
  0x13   : > { %s149_s6 = sshll.u32 %s141_s5, 4  ;;  %p1202_p13 = pnand %p894_p10, %p1174_p5  ;;  %s1206_s6 = int_to_ptr.vmem [resolvable:$true] %s149_s6 }
  0x14   : > { %s138_s8 = scalar_lea.sflag [#allocation5], %s137_s26  ;;  %s975_s9 = scalar_lea.hbm %s1198_s4, 128 }
  0x15   : > { %p976_p2 = scmp.ne.s32.totalorder %s1198_s4, %s975_s9  ;;  %p977_p3 = pneg %p1202_p13 }
  0x16   : > { %s980_s17 = scalar_lea.hbm %s1396_s0, 256  ;;  %p981_p5 = scmp.lt.u32.totalorder %s1198_s4, %s1396_s0 }
  0x17   : > { %p978_p4 = pnand %p977_p3, %p976_p2  ;;  %p982_p8 = scmp.lt.u32.totalorder %s980_s17, %s975_s9 }
  0x18   : > { %p984_p9 = scmp.lt.u32.totalorder %s975_s9, %s1198_s4 }
  0x19   : > { %p979_p7 = pneg %p978_p4  ;;  %p983_p10 = por %p982_p8, %p981_p5 }
  0x1b   : > { %p985_p0 = por %p984_p9, %p983_p10 }
  0x1d   : > { %p986_p1 = pnand %p985_p0, %p979_p7 }
  0x1f   : > { %989 = shalt.err (!%p986_p1)
}
  0x20   : > { %s990_s22 = scalar_lea.vmem %s1206_s6, 128  ;;  %s1073_s26 = smov [#allocation4]  }
  0x21   : > { %p991_p2 = scmp.ne.s32.totalorder %s1206_s6, %s990_s22  ;;  %s995_s27 = sshll.u32 %s1073_s26, 4  ;;  %s996_s27 = int_to_ptr.vmem [resolvable:$false] %s995_s27 }
  0x22   : > { %s997_s28 = scalar_lea.vmem %s996_s27, 256  ;;  %p998_p11 = scmp.lt.s32.totalorder %s1206_s6, %s996_s27 }
  0x23   : > { %p993_p4 = pnand %p991_p2, %p977_p3  ;;  %p999_p5 = scmp.lt.s32.totalorder %s997_s28, %s990_s22 }
  0x25   : > { %p994_p12 = pneg %p993_p4  ;;  %p1000_p8 = por %p999_p5, %p998_p11 }
  0x27   : > { %p1001_p9 = pnand %p1000_p8, %p994_p12 }
  0x29   : > { %1004 = shalt.err (!%p1001_p9)
}
  0x2a   : > { %889 = dma.hbm_to_vmem [thread:$0]  (!%p1202_p13), %s1198_s4, 128, %s1206_s6, %s138_s8  }
  0x2b   : > { %p1406_p0 = scmp.lt.s32.totalorder %s1071_s15, 3  ;;  %p1407_p1 = scmp.ge.s32.totalorder %s1071_s15, 1 }
  0x2d   : > { %p155_p3 = pnand %p1407_p1, %p1406_p0 }
  0x2e   : > { %s1240_s29 = sand.u32 (!%p155_p3), 1, %s1063_s13  }
  0x2f   : > { %158 = sbr.rel (%p155_p3) target bundleno = 753 (0x2f1), region = 32  ;;  %s835_s30 = sshll.u32 (!%p155_p3), %s1240_s29, 3 }
  0x30   : > { %s161_s5 = scalar_lea.sflag (!%p155_p3), [#allocation5], %s1240_s29  ;;  %s1244_s9 = scalar_lea.vmem (!%p155_p3), [#allocation4], %s835_s30 }
  0x36   : > { %1050 = dma.done.wait (%p1178_p6), %s161_s5, 128  }
  0x37   : > { %1052 = vsyncadd (%p1178_p6), %s161_s5, 4294967168  ;;  %v1074_v0 = vmov 0.0   ;;  %v204_v1 = vld [vmem:[%s1244_s9] sm:$0xf]  ;;  %s1075_s4 = smov 23   ;;  %s1076_s6 = smov 19  }
  0x38   : > { %187 = vst [vmem:[#allocation2] sm:$0xff] %v1074_v0  ;;  %586 = vmatprep.mubr.f32.mxu0 %v1074_v0  ;;  %v190_v2 = vld [vmem:[%s1244_s9] sm:$0xf]  ;;  %206 = vrot.lane.b32.xlu1 %v204_v1, %s1075_s4  ;;  %s1077_s23 = smov 25   ;;  %s1078_s7 = smov 21   ;;  %vm188_vm0 = vcmask 551936  }
  0x39   : > { %192 = vrot.lane.b32.xlu0 %v190_v2, %s1076_s6  ;;  %v211_v3 = vld [vmem:[%s1244_s9] sm:$0xf]  ;;  %s1079_s8 = smov 27   ;;  %s1080_s10 = smov 31   ;;  %189 = vst.msk [vmem:[#allocation2 + $0x8] sm:$0xf] %vm188_vm0, %v1074_v0 }
  0x3a   : > { %v197_v4 = vld [vmem:[%s1244_s9] sm:$0xf]  ;;  %s1081_s11 = smov 33   ;;  %s1082_s17 = smov 29   ;;  %v258_v9 = vld [vmem:[%s1244_s9 + $0x4] sm:$0xf] }
  0x3b   : > { %v218_v5 = vld [vmem:[%s1244_s9] sm:$0xf]  ;;  %v251_v10 = vld [vmem:[%s1244_s9 + $0x4] sm:$0xf]  ;;  %s1083_s19 = smov 37   ;;  %s1084_s20 = smov 35  }
  0x3c   : > { %213 = vrot.lane.b32.xlu1 %v211_v3, %s1077_s23  ;;  %v232_v6 = vld [vmem:[%s1244_s9] sm:$0xf]  ;;  %v286_v11 = vld [vmem:[%s1244_s9 + $0x4] sm:$0xf]  ;;  %s1085_s22 = smov 45   ;;  %s1086_s26 = smov 39  }
  0x3d   : > { %199 = vrot.lane.b32.xlu0 %v197_v4, %s1078_s7  ;;  %v244_v7 = vld [vmem:[%s1244_s9] sm:$0xf]  ;;  %v265_v12 = vld [vmem:[%s1244_s9 + $0x4] sm:$0xf]  ;;  %s1087_s27 = smov 41   ;;  %s1088_s28 = smov 43  }
  0x3e   : > { %v225_v8 = vld [vmem:[%s1244_s9] sm:$0xf]  ;;  %v272_v13 = vld [vmem:[%s1244_s9 + $0x4] sm:$0xf]  ;;  %s1089_s30 = smov 47   ;;  %s1090_s5 = smov 49  }
  0x3f   : > { %v279_v14 = vld [vmem:[%s1244_s9 + $0x4] sm:$0xf]  ;;  %vm195_vm1 = vcmask 281752   ;;  %vm202_vm2 = vcmask 429352   ;;  %vm209_vm3 = vcmask 576952   ;;  %vm216_vm4 = vcmask 724552  }
  0x40   : > { %220 = vrot.lane.b32.xlu1 %v218_v5, %s1079_s8  ;;  %v298_v15 = vld [vmem:[%s1244_s9 + $0x4] sm:$0xf]  ;;  %vm223_vm5 = vcmask 872152   ;;  %vm240_vm6 = vcmask 1044472   ;;  %vm241_vm7 = vcmask 121860   ;;  %vm237_vm8 = vcmask 252928  }
  0x41   : > { %234 = vrot.lane.b32.xlu0 %v232_v6, %s1080_s10  ;;  %v305_v16 = vld [vmem:[%s1244_s9 + $0x4] sm:$0xf]  ;;  %vm230_vm9 = vcmask 1019752   ;;  %vm242_vm10 = vmor %vm241_vm7, %vm240_vm6  ;;  %vm249_vm11 = vcmask 265352   ;;  %vm256_vm12 = vcmask 412952   ;;  %vm263_vm13 = vcmask 560552  }
  0x42   : > { %vm270_vm14 = vcmask 708152   ;;  %vm294_vm15 = vcmask 1044456   ;;  %vm295_vm0 = vcmask 105476   ;;  %vm310_vm6 = vcmask 396552   ;;  %s1091_s9 = smov 126   ;;  %s1092_s4 = smov 127  }
  0x43   : > { %s1093_s6 = smov 108   ;;  %s1094_s23 = smov 110   ;;  %vm319_vm7 = vcmask 240640   ;;  %v1098_v45 = vmov 0.0|0.0   ;;  %v1101_v50 = vmov 0   ;;  %v502_v51 = vld [vmem:[%s1398_s2] sm:$0xff] }
  0x44   : > { %246 = vrot.lane.b32.xlu1 %v244_v7, %s1081_s11  ;;  %s1095_s7 = smov 91   ;;  %s1096_s8 = smov 109   ;;  %876 = vmatprep.subr.bf16.mxu1 %v1098_v45 }
  0x45   : > { %227 = vrot.lane.b32.xlu0 %v225_v8, %s1082_s17  ;;  %s1097_s10 = smov 92   ;;  %s1100_s11 = smov 90  }
  0x46   : > { %968 = vset.pattern.permute.xlu0 %v1101_v50  ;;  %s1111_s17 = smov 102   ;;  %p1408_p11 = scmp.ne.s32.totalorder %s1403_s24, 0 }
  0x48   : > { %260 = vrot.lane.b32.xlu1 %v258_v9, %s1083_s19  ;;  %s1112_s19 = smov 112  }
  0x49   : > { %253 = vrot.lane.b32.xlu0 %v251_v10, %s1084_s20 }
  0x4c   : > { %288 = vrot.lane.b32.xlu1 %v286_v11, %s1085_s22 }
  0x4d   : > { %267 = vrot.lane.b32.xlu0 %v265_v12, %s1086_s26  ;;  %s836_s26 = sshll.u32 %s1240_s29, 4 }
  0x50   : > { %281 = vrot.lane.b32.xlu1 %v279_v14, %s1088_s28  ;;  %s1312_s28 = scalar_lea.vmem [#allocation7], %s836_s26 }
  0x51   : > { %274 = vrot.lane.b32.xlu0 %v272_v13, %s1087_s27  ;;  %s1102_s27 = smov 100   ;;  %s758_s20 = sshll.u32 %s1312_s28, 4  ;;  %s1353_s20 = int_to_ptr.vmem [resolvable:$true] %s758_s20 }
  0x54   : > { %307 = vrot.lane.b32.xlu1 %v305_v16, %s1090_s5  ;;  %s1104_s5 = smov 124  }
  0x55   : > { %300 = vrot.lane.b32.xlu0 %v298_v15, %s1089_s30  ;;  %s1103_s30 = smov 114  }
  0xaa   : > { %v207_v17 = vpop.permute.xlu1 %206 }
  0xab   : > { %v193_v18 = vpop.permute.xlu0 %192 }
  0xac   : > { %196 = vst.msk [vmem:[#allocation2] sm:$0xf] %vm195_vm1, %v193_v18  ;;  %vm277_vm1 = vcmask 855752  }
  0xae   : > { %v214_v19 = vpop.permute.xlu1 %213 }
  0xaf   : > { %v200_v20 = vpop.permute.xlu0 %199 }
  0xb0   : > { %203 = vst.msk [vmem:[#allocation2] sm:$0xf] %vm202_vm2, %v200_v20  ;;  %vm291_vm2 = vcmask 367616  }
  0xb1   : > { %210 = vst.msk [vmem:[#allocation2] sm:$0xf] %vm209_vm3, %v207_v17  ;;  %vm284_vm3 = vcmask 1003352  }
  0xb2   : > { %217 = vst.msk [vmem:[#allocation2] sm:$0xf] %vm216_vm4, %v214_v19  ;;  %v221_v21 = vpop.permute.xlu1 %220  ;;  %vm296_vm4 = vmor %vm295_vm0, %vm294_vm15  ;;  %vm341_vm15 = vcmask 244740   ;;  %vm457_vm0 = vcmask 744448  }
  0xb3   : > { %v235_v22 = vpop.permute.xlu0 %234  ;;  %224 = vst.msk [vmem:[#allocation2] sm:$0xf] %vm223_vm5, %v221_v21  ;;  %vm303_vm5 = vcmask 248952  }
  0xb4   : > { %v236_v23 = vrot.slane %v235_v22, 4 }
  0xb6   : > { %v247_v24 = vpop.permute.xlu1 %246  ;;  %v238_v26 = vsel %vm237_vm8, %v236_v23, %v235_v22  ;;  %vm1099_vm8 = vmmov 0  }
  0xb7   : > { %v228_v25 = vpop.permute.xlu0 %227  ;;  %865 = vmatprep.mubr.msk.f32.mxu1 %vm1099_vm8, %v1074_v0  ;;  %vm684_vm8 = vcmask 654848  }
  0xb8   : > { %231 = vst.msk [vmem:[#allocation2] sm:$0xf] %vm230_vm9, %v228_v25  ;;  %vm354_vm9 = vcmask 1031168  }
  0xb9   : > { %243 = vst.msk [vmem:[#allocation2] sm:$0xff] %vm242_vm10, %v238_v26  ;;  %vm333_vm10 = vcmask 1039360  }
  0xba   : > { %250 = vst.msk [vmem:[#allocation2 + $0x4] sm:$0xf] %vm249_vm11, %v247_v24  ;;  %v261_v27 = vpop.permute.xlu1 %260  ;;  %vm375_vm11 = vcmask 900096  }
  0xbb   : > { %v254_v28 = vpop.permute.xlu0 %253 }
  0xbc   : > { %257 = vst.msk [vmem:[#allocation2 + $0x4] sm:$0xf] %vm256_vm12, %v254_v28  ;;  %vm395_vm12 = vcmask 891904  }
  0xbd   : > { %264 = vst.msk [vmem:[#allocation2 + $0x4] sm:$0xf] %vm263_vm13, %v261_v27  ;;  %vm436_vm13 = vcmask 752640  }
  0xbe   : > { %v289_v29 = vpop.permute.xlu1 %288 }
  0xbf   : > { %v268_v30 = vpop.permute.xlu0 %267  ;;  %v290_v31 = vrot.slane %v289_v29, 4 }
  0xc0   : > { %271 = vst.msk [vmem:[#allocation2 + $0x4] sm:$0xf] %vm270_vm14, %v268_v30  ;;  %vm416_vm14 = vcmask 883712  }
  0xc1   : > { %v292_v34 = vsel %vm291_vm2, %v290_v31, %v289_v29  ;;  %vm512_vm2 = vcmask 1043456  }
  0xc2   : > { %v282_v33 = vpop.permute.xlu1 %281 }
  0xc3   : > { %v275_v32 = vpop.permute.xlu0 %274 }
  0xc4   : > { %278 = vst.msk [vmem:[#allocation2 + $0x4] sm:$0xf] %vm277_vm1, %v275_v32  ;;  %vm477_vm1 = vcmask 736256  }
  0xc5   : > { %285 = vst.msk [vmem:[#allocation2 + $0x4] sm:$0xf] %vm284_vm3, %v282_v33  ;;  %vm508_vm3 = vcmask 293888  }
  0xc6   : > { %297 = vst.msk [vmem:[#allocation2 + $0x4] sm:$0xff] %vm296_vm4, %v292_v34  ;;  %v308_v36 = vpop.permute.xlu1 %307  ;;  %vm663_vm4 = vcmask 130048  }
  0xc7   : > { %v301_v35 = vpop.permute.xlu0 %300 }
  0xc8   : > { %304 = vst.msk [vmem:[#allocation2 + $0x8] sm:$0xf] %vm303_vm5, %v301_v35  ;;  %vm669_vm5 = vcmask 261248  }
  0xc9   : > { %311 = vst.msk [vmem:[#allocation2 + $0x8] sm:$0xf] %vm310_vm6, %v308_v36  ;;  %vm674_vm6 = vcmask 392448  }
  0xcd   : > { %v343_v37 = vld [vmem:[#allocation2] sm:$0xff] }
  0xce   : > { %348 = vrot.lane.b32.xlu1 %v343_v37, %s1091_s9  ;;  %v347_v38 = vcombine.high %v343_v37, %v343_v37  ;;  %329 = vrot.lane.b32.xlu0 %v343_v37, %s1092_s4  ;;  %317 = vst [vmem:[#allocation3] sm:$0xf] %v343_v37  ;;  %v325_v40 = vcombine.low %v343_v37, %v343_v37 }
  0xd0   : > { %318 = vst [vmem:[#allocation3 + $0x8] sm:$0xf] %v347_v38  ;;  %v313_v39 = vld [vmem:[#allocation2 + $0x8] sm:$0xf] }
  0xd1   : > { %320 = vst.msk [vmem:[#allocation3 + $0x10] sm:$0xf] %vm319_vm7, %v313_v39  ;;  %v344_v41 = vld [vmem:[#allocation2 + $0x8] sm:$0xf] }
  0xd2   : > { %412 = vrot.lane.b32.xlu1 %v343_v37, %s1093_s6  ;;  %371 = vrot.lane.b32.xlu0 %v343_v37, %s1094_s23  ;;  %v385_v42 = vld [vmem:[#allocation2 + $0x8] sm:$0xf] }
  0xd3   : > { %v426_v43 = vld [vmem:[#allocation2 + $0x8] sm:$0xf] }
  0xd4   : > { %v971_v44 = vld [vmem:[#allocation2 + $0x8] ss:$0 sps:$4 sm:$0xff]  }
  0xd5   : > { %v972_v46 = vld [vmem:[#allocation2 + $0x8] ss:$0 sps:$4 sm:$0xff]  }
  0xd6   : > { %453 = vrot.lane.b32.xlu1 %v343_v37, %s1095_s7  ;;  %350 = vrot.lane.b32.xlu0 %v347_v38, %s1091_s9  ;;  %v973_v47 = vld [vmem:[#allocation2 + $0x8] ss:$0 sps:$4 sm:$0xff]  }
  0xd7   : > { %v974_v48 = vld [vmem:[#allocation2 + $0x8] ss:$0 sps:$4 sm:$0xff]  }
  0xd8   : > { %v467_v49 = vld [vmem:[#allocation2 + $0x8] sm:$0xf] }
  0xda   : > { %389 = vrot.lane.b32.xlu1 %v343_v37, %s1096_s8  ;;  %327 = vrot.lane.b32.xlu0 %v325_v40, %s1092_s4 }
  0xde   : > { %369 = vrot.lane.b32.xlu0 %v325_v40, %s1094_s23  ;;  %352 = vrot.lane.b32.xlu1 %v344_v41, %s1091_s9 }
  0xe2   : > { %393 = vrot.lane.b32.xlu0 %v385_v42, %s1096_s8  ;;  %391 = vrot.lane.b32.xlu1 %v347_v38, %s1096_s8  ;;  %s1107_s8 = smov 106  }
  0xe6   : > { %434 = vrot.lane.b32.xlu0 %v426_v43, %s1097_s10  ;;  %432 = vrot.lane.b32.xlu1 %v347_v38, %s1097_s10 }
  0xea   : > { %410 = vrot.lane.b32.xlu0 %v325_v40, %s1093_s6  ;;  %331 = vrot.lane.b32.xlu1 %v971_v44, %s1092_s4  ;;  %s1105_s4 = smov 122  }
  0xee   : > { %414 = vrot.lane.b32.xlu0 %v972_v46, %s1093_s6  ;;  %373 = vrot.lane.b32.xlu1 %v973_v47, %s1094_s23  ;;  %v486_v47 = vld [vmem:[%s1397_s1] sm:$0xff] }
  0xf2   : > { %455 = vrot.lane.b32.xlu0 %v974_v48, %s1095_s7  ;;  %430 = vrot.lane.b32.xlu1 %v343_v37, %s1097_s10  ;;  %s1109_s10 = smov 104  }
  0xf6   : > { %451 = vrot.lane.b32.xlu0 %v325_v40, %s1095_s7  ;;  %473 = vrot.lane.b32.xlu1 %v347_v38, %s1100_s11  ;;  %s1106_s7 = smov 120  }
  0xfa   : > { %475 = vrot.lane.b32.xlu0 %v467_v49, %s1100_s11  ;;  %471 = vrot.lane.b32.xlu1 %v343_v37, %s1100_s11  ;;  %s1110_s11 = smov 116  }
  0xfe   : > { %505 = vperm.xlu0 %968, %v502_v51  }
 0x140   : > { %v349_v52 = vpop.permute.xlu1 %348  ;;  %v330_v53 = vpop.permute.xlu0 %329 }
 0x144   : > { %v413_v54 = vpop.permute.xlu1 %412  ;;  %v372_v55 = vpop.permute.xlu0 %371 }
 0x148   : > { %v454_v56 = vpop.permute.xlu1 %453  ;;  %v351_v57 = vpop.permute.xlu0 %350 }
 0x149   : > { %v355_v58 = vsel %vm354_vm9, %v349_v52, %v351_v57 }
 0x14a   : > { %360 = vst [vmem:[#allocation3 + $0x18] sm:$0xf] %v355_v58 }
 0x14c   : > { %v390_v59 = vpop.permute.xlu1 %389  ;;  %v328_v60 = vpop.permute.xlu0 %327 }
 0x14d   : > { %v334_v61 = vsel %vm333_vm10, %v328_v60, %v330_v53 }
 0x14e   : > { %339 = vst [vmem:[#allocation3] sm:$0xf0] %v334_v61 }
 0x150   : > { %v370_v62 = vpop.permute.xlu0 %369  ;;  %v353_v63 = vpop.permute.xlu1 %352 }
 0x151   : > { %v376_v1 = vsel %vm375_vm11, %v370_v62, %v372_v55  ;;  %v356_v2 = vsel %vm354_vm9, %v351_v57, %v353_v63  ;;  %362 = vst.msk [vmem:[#allocation3 + $0x28] sm:$0xf] %vm319_vm7, %v353_v63  ;;  %vm689_vm9 = vcmask 786048  }
 0x152   : > { %381 = vst [vmem:[#allocation3 + $0x18] sm:$0xf0] %v376_v1  ;;  %361 = vst [vmem:[#allocation3 + $0x20] sm:$0xf] %v356_v2 }
 0x154   : > { %v394_v3 = vpop.permute.xlu0 %393  ;;  %v392_v4 = vpop.permute.xlu1 %391 }
 0x155   : > { %403 = vst.msk [vmem:[#allocation3 + $0x40] sm:$0xf] %vm319_vm7, %v394_v3  ;;  %v396_v5 = vsel %vm395_vm12, %v390_v59, %v392_v4  ;;  %v397_v6 = vsel %vm395_vm12, %v392_v4, %v394_v3  ;;  %v487_v32 = vld [vmem:[#allocation3] sm:$0xff]  ;;  %vm704_vm12 = vcmask 1048448  }
 0x156   : > { %401 = vst [vmem:[#allocation3 + $0x30] sm:$0xf] %v396_v5  ;;  %402 = vst [vmem:[#allocation3 + $0x38] sm:$0xf] %v397_v6 }
 0x158   : > { %v435_v7 = vpop.permute.xlu0 %434  ;;  %v433_v8 = vpop.permute.xlu1 %432 }
 0x159   : > { %444 = vst.msk [vmem:[#allocation3 + $0x58] sm:$0xf] %vm319_vm7, %v435_v7  ;;  %v438_v9 = vsel %vm436_vm13, %v433_v8, %v435_v7  ;;  %v490_v26 = vld [vmem:[#allocation3 + $0x18] sm:$0xff] }
 0x15a   : > { %443 = vst [vmem:[#allocation3 + $0x50] sm:$0xf] %v438_v9  ;;  %v870_v33 = vpack.c.bf16 %v490_v26, %v487_v32 }
 0x15c   : > { %v411_v10 = vpop.permute.xlu0 %410  ;;  %v332_v11 = vpop.permute.xlu1 %331 }
 0x15d   : > { %v417_v12 = vsel %vm416_vm14, %v411_v10, %v413_v54  ;;  %v335_v13 = vsel %vm333_vm10, %v330_v53, %v332_v11  ;;  %342 = vst.msk [vmem:[#allocation3 + $0x10] sm:$0xf0] %vm341_vm15, %v332_v11  ;;  %vm694_vm10 = vcmask 917248  }
 0x15e   : > { %422 = vst [vmem:[#allocation3 + $0x30] sm:$0xf0] %v417_v12  ;;  %340 = vst [vmem:[#allocation3 + $0x8] sm:$0xf0] %v335_v13 }
 0x160   : > { %v415_v14 = vpop.permute.xlu0 %414  ;;  %v374_v15 = vpop.permute.xlu1 %373 }
 0x161   : > { %v418_v16 = vsel %vm416_vm14, %v413_v54, %v415_v14  ;;  %424 = vst.msk [vmem:[#allocation3 + $0x40] sm:$0xf0] %vm341_vm15, %v415_v14  ;;  %v377_v17 = vsel %vm375_vm11, %v372_v55, %v374_v15  ;;  %383 = vst.msk [vmem:[#allocation3 + $0x28] sm:$0xf0] %vm341_vm15, %v374_v15  ;;  %vm735_vm11 = vcmask 818176  }
 0x162   : > { %423 = vst [vmem:[#allocation3 + $0x38] sm:$0xf0] %v418_v16  ;;  %382 = vst [vmem:[#allocation3 + $0x20] sm:$0xf0] %v377_v17 }
 0x164   : > { %v456_v18 = vpop.permute.xlu0 %455  ;;  %v431_v19 = vpop.permute.xlu1 %430  ;;  %v489_v24 = vld [vmem:[#allocation3 + $0x10] sm:$0xff] }
 0x165   : > { %v459_v20 = vsel %vm457_vm0, %v454_v56, %v456_v18  ;;  %465 = vst.msk [vmem:[#allocation3 + $0x58] sm:$0xf0] %vm341_vm15, %v456_v18  ;;  %v437_v21 = vsel %vm436_vm13, %v431_v19, %v433_v8  ;;  %v488_v29 = vld [vmem:[#allocation3 + $0x8] sm:$0xff]  ;;  %v493_v44 = vld [vmem:[#allocation3 + $0x30] sm:$0xff]  ;;  %vm701_vm13 = vcmask 932864  }
 0x166   : > { %464 = vst [vmem:[#allocation3 + $0x50] sm:$0xf0] %v459_v20  ;;  %442 = vst [vmem:[#allocation3 + $0x48] sm:$0xf] %v437_v21 }
 0x168   : > { %v452_v22 = vpop.permute.xlu0 %451  ;;  %v474_v23 = vpop.permute.xlu1 %473  ;;  %v492_v25 = vld [vmem:[#allocation3 + $0x28] sm:$0xff]  ;;  %v495_v36 = vld [vmem:[#allocation3 + $0x40] sm:$0xff] }
 0x169   : > { %v458_v27 = vsel %vm457_vm0, %v452_v22, %v454_v56  ;;  %v877_v28 = vpack.c.bf16 %v492_v25, %v489_v24  ;;  %v491_v30 = vld [vmem:[#allocation3 + $0x20] sm:$0xff]  ;;  %v494_v41 = vld [vmem:[#allocation3 + $0x38] sm:$0xff] }
 0x16a   : > { %463 = vst [vmem:[#allocation3 + $0x48] sm:$0xf0] %v458_v27  ;;  %v868_v31 = vpack.c.bf16 %v491_v30, %v488_v29 }
 0x16b   : > { %878 = vmatpush3.bf16.msra.mxu1 %v877_v28 }
 0x16c   : > { %v476_v34 = vpop.permute.xlu0 %475  ;;  %869 = vmatprep.subr.bf16.mxu0 %v868_v31  ;;  %v472_v35 = vpop.permute.xlu1 %471  ;;  %879 = vmatprep.subr.bf16.mxu1 %v1098_v45  ;;  %v498_v37 = vld [vmem:[#allocation3 + $0x58] sm:$0xff] }
 0x16d   : > { %v479_v38 = vsel %vm477_vm1, %v474_v23, %v476_v34  ;;  %485 = vst.msk [vmem:[#allocation3 + $0x70] sm:$0xf] %vm319_vm7, %v476_v34  ;;  %v478_v39 = vsel %vm477_vm1, %v472_v35, %v474_v23  ;;  %871 = vmatpush1.bf16.msra.mxu0 %v870_v33  ;;  %v880_v40 = vpack.c.bf16 %v498_v37, %v495_v36  ;;  %v497_v42 = vld [vmem:[#allocation3 + $0x50] sm:$0xff]  ;;  %vm679_vm7 = vcmask 523648  }
 0x16e   : > { %484 = vst [vmem:[#allocation3 + $0x68] sm:$0xf] %v479_v38  ;;  %483 = vst [vmem:[#allocation3 + $0x60] sm:$0xf] %v478_v39  ;;  %v872_v43 = vpack.c.bf16 %v497_v42, %v494_v41 }
 0x16f   : > { %881 = vmatpush3.bf16.msra.mxu1 %v880_v40 }
 0x170   : > { %873 = vmatprep.subr.bf16.mxu0 %v872_v43  ;;  %863 = vmatprep.subr.mxu1 %v1074_v0 }
 0x171   : > { %v496_v46 = vld [vmem:[#allocation3 + $0x48] sm:$0xff] }
 0x172   : > { %v874_v45 = vpack.c.bf16 %v496_v46, %v493_v44 }
 0x174   : > { %875 = vmatpush1.bf16.msra.mxu0 %v874_v45  ;;  %v501_v48 = vld [vmem:[#allocation3 + $0x70] sm:$0xf] }
 0x175   : > { %864 = vmatpush3.msk.msra.mxu1 %vm512_vm2, %v501_v48  ;;  %v500_v49 = vld [vmem:[#allocation3 + $0x68] sm:$0xf]  ;;  %v499_v50 = vld [vmem:[#allocation3 + $0x60] sm:$0xf] }
 0x176   : > { %837 = vmatprep.subr.msk.mxu0 %vm512_vm2, %v500_v49  ;;  %866 = vmatmul.mubr.msk.f32.vlgmr.msra.gmra.mrb[0].mxu1 %vm508_vm3, %v486_v47 }
 0x178   : > { %838 = vmatpush1.msk.msra.mxu0 %vm512_vm2, %v499_v50 }
 0x179   : > { %839 = vmatmul.mubr.msk.f32.vlgmr.msra.gmra.mrb[0].mxu0 %vm508_vm3, %v486_v47 }
 0x17d   : > { %v506_v0 = vpop.permute.xlu0 %505 }
 0x249   : > { %v659_v51 = vpop.f32.mrb[0].mxu1 }
 0x24a   : > { %v660_v52 = vadd.f32 %v659_v51, %v506_v0  ;;  %v867_v53 = vpop.f32.mrb[1].mxu1 }
 0x24c   : > { %v588_v54 = vpop.f32.mrb[0].mxu0  ;;  %733 = vrot.lane.b32.xlu0 %v660_v52, %s1102_s27 }
 0x24d   : > { %v589_v55 = vadd.f32 %v588_v54, %v506_v0  ;;  %v590_v56 = vpop.f32.mrb[1].mxu0 }
 0x24e   : > { %v591_v57 = vadd.f32 %v590_v56, %v506_v0 }
 0x24f   : > { %666 = vrot.lane.b32.xlu1 %v589_v55, %s1091_s9  ;;  %664 = vst.msk [vmem:[%s1312_s28] sm:$0xff] %vm663_vm4, %v589_v55  ;;  %s1108_s9 = smov 118  }
 0x250   : > { %697 = vrot.lane.b32.xlu0 %v589_v55, %s1103_s30 }
 0x253   : > { %671 = vrot.lane.b32.xlu1 %v589_v55, %s1104_s5  ;;  %s1114_s5 = smov [#allocation7]  }
 0x254   : > { %710 = vrot.lane.b32.xlu0 %v591_v57, %s1094_s23  ;;  %s1113_s23 = smov 98  }
 0x257   : > { %676 = vrot.lane.b32.xlu1 %v589_v55, %s1105_s4  ;;  %s1009_s4 = sshll.u32 %s1114_s5, 4  ;;  %s1010_s4 = int_to_ptr.vmem [resolvable:$false] %s1009_s4 }
 0x258   : > { %714 = vrot.lane.b32.xlu0 %v591_v57, %s1093_s6  ;;  %s848_s6 = sshll.u32 %s1156_s16, 8  ;;  %s744_s16 = scalar_lea.sflag [#allocation6], %s1240_s29 }
 0x259   : > { %p1012_p7 = scmp.lt.s32.totalorder %s1353_s20, %s1010_s4 }
 0x25b   : > { %681 = vrot.lane.b32.xlu1 %v589_v55, %s1106_s7  ;;  %s1011_s7 = scalar_lea.vmem %s1010_s4, 512 }
 0x25c   : > { %718 = vrot.lane.b32.xlu0 %v591_v57, %s1107_s8 }
 0x25f   : > { %686 = vrot.lane.b32.xlu1 %v589_v55, %s1108_s9 }
 0x260   : > { %722 = vrot.lane.b32.xlu0 %v591_v57, %s1109_s10 }
 0x263   : > { %691 = vrot.lane.b32.xlu1 %v589_v55, %s1110_s11 }
 0x264   : > { %726 = vrot.lane.b32.xlu0 %v591_v57, %s1111_s17 }
 0x267   : > { %706 = vrot.lane.b32.xlu1 %v591_v57, %s1112_s19 }
 0x268   : > { %739 = vrot.lane.b32.xlu0 %v660_v52, %s1113_s23 }
 0x26b   : > { %731 = vrot.lane.b32.xlu1 %v591_v57, %s1102_s27  ;;  %s1351_s27 = scalar_lea.hbm %s1399_s3, %s848_s6 }
 0x26f   : > { %699 = vrot.lane.b32.xlu1 %v591_v57, %s1103_s30  ;;  %s1005_s30 = scalar_lea.vmem %s1353_s20, 256 }
 0x270   : > { %p1006_p6 = scmp.ne.s32.totalorder %s1353_s20, %s1005_s30  ;;  %p1013_p10 = scmp.lt.s32.totalorder %s1011_s7, %s1005_s30 }
 0x272   : > { %p1007_p12 = pnand %p1006_p6, %p1408_p11  ;;  %p1014_p2 = por %p1013_p10, %p1012_p7 }
 0x274   : > { %p1008_p13 = pneg %p1007_p12 }
 0x276   : > { %p1015_p4 = pnand %p1014_p2, %p1008_p13 }
 0x2be   : > { %v734_v58 = vpop.permute.xlu0 %733 }
 0x2c1   : > { %v667_v59 = vpop.permute.xlu1 %666 }
 0x2c2   : > { %670 = vst.msk [vmem:[%s1312_s28] sm:$0xff] %vm669_vm5, %v667_v59  ;;  %v698_v60 = vpop.permute.xlu0 %697 }
 0x2c5   : > { %v672_v61 = vpop.permute.xlu1 %671 }
 0x2c6   : > { %675 = vst.msk [vmem:[%s1312_s28] sm:$0xff] %vm674_vm6, %v672_v61  ;;  %v711_v62 = vpop.permute.xlu0 %710 }
 0x2c9   : > { %v677_v63 = vpop.permute.xlu1 %676 }
 0x2ca   : > { %680 = vst.msk [vmem:[%s1312_s28] sm:$0xff] %vm679_vm7, %v677_v63  ;;  %v715_v1 = vpop.permute.xlu0 %714 }
 0x2cd   : > { %v682_v2 = vpop.permute.xlu1 %681 }
 0x2ce   : > { %685 = vst.msk [vmem:[%s1312_s28] sm:$0xff] %vm684_vm8, %v682_v2  ;;  %v719_v3 = vpop.permute.xlu0 %718 }
 0x2d1   : > { %v687_v4 = vpop.permute.xlu1 %686 }
 0x2d2   : > { %690 = vst.msk [vmem:[%s1312_s28] sm:$0xff] %vm689_vm9, %v687_v4  ;;  %v723_v5 = vpop.permute.xlu0 %722 }
 0x2d5   : > { %v692_v6 = vpop.permute.xlu1 %691 }
 0x2d6   : > { %695 = vst.msk [vmem:[%s1312_s28] sm:$0xff] %vm694_vm10, %v692_v6  ;;  %v727_v8 = vpop.permute.xlu0 %726 }
 0x2d9   : > { %v707_v7 = vpop.permute.xlu1 %706 }
 0x2da   : > { %709 = vst.msk [vmem:[%s1312_s28 + $0x8] sm:$0xff] %vm663_vm4, %v707_v7  ;;  %v740_v11 = vpop.permute.xlu0 %739 }
 0x2db   : > { %713 = vst.msk [vmem:[%s1312_s28 + $0x8] sm:$0xff] %vm669_vm5, %v711_v62 }
 0x2dc   : > { %717 = vst.msk [vmem:[%s1312_s28 + $0x8] sm:$0xff] %vm674_vm6, %v715_v1 }
 0x2dd   : > { %721 = vst.msk [vmem:[%s1312_s28 + $0x8] sm:$0xff] %vm679_vm7, %v719_v3  ;;  %v732_v9 = vpop.permute.xlu1 %731 }
 0x2de   : > { %725 = vst.msk [vmem:[%s1312_s28 + $0x8] sm:$0xff] %vm684_vm8, %v723_v5  ;;  %v736_v10 = vsel %vm735_vm11, %v732_v9, %v734_v58 }
 0x2df   : > { %729 = vst.msk [vmem:[%s1312_s28 + $0x8] sm:$0xff] %vm689_vm9, %v727_v8 }
 0x2e0   : > { %738 = vst.msk [vmem:[%s1312_s28 + $0x8] sm:$0xff] %vm694_vm10, %v736_v10 }
 0x2e1   : > { %v700_v12 = vpop.permute.xlu1 %699  ;;  %742 = vst.msk [vmem:[%s1312_s28 + $0x8] sm:$0xff] %vm704_vm12, %v740_v11 }
 0x2e2   : > { %v702_v13 = vsel %vm701_vm13, %v698_v60, %v700_v12 }
 0x2e3   : > { %705 = vst.msk [vmem:[%s1312_s28] sm:$0xff] %vm704_vm12, %v702_v13 }
 0x2e4   : > { %1018 = shalt.err (!%p1015_p4)
}
 0x2e5   : > { %s1019_s29 = scalar_lea.hbm %s1351_s27, 256  ;;  %s1023_s9 = scalar_lea.hbm %s1399_s3, 512 }
 0x2e6   : > { %p1020_p5 = scmp.ne.s32.totalorder %s1351_s27, %s1019_s29  ;;  %p1024_p0 = scmp.lt.u32.totalorder %s1351_s27, %s1399_s3 }
 0x2e7   : > { %p1025_p1 = scmp.lt.u32.totalorder %s1023_s9, %s1019_s29  ;;  %p1027_p6 = scmp.lt.u32.totalorder %s1019_s29, %s1351_s27 }
 0x2e8   : > { %p1021_p8 = pnand %p1020_p5, %p1408_p11 }
 0x2e9   : > { %p1026_p3 = por %p1025_p1, %p1024_p0 }
 0x2ea   : > { %p1022_p9 = pneg %p1021_p8 }
 0x2eb   : > { %p1028_p12 = por %p1027_p6, %p1026_p3 }
 0x2ed   : > { %p1029_p13 = pnand %p1028_p12, %p1022_p9 }
 0x2ef   : > { %1032 = shalt.err (!%p1029_p13)
}
 0x2f0   : > { %884 = dma.vmem_to_hbm [thread:$0]  (%p1408_p11), %s1353_s20, 256, %s1351_s27, %s744_s16  }
 0x2f1 PF: > { %s770_s17 = sand.u32 1, %s1059_s12   ;;  %p1409_p7 = scmp.ne.s32.totalorder %s1404_s25, 0 }
 0x2f2   : > { %p1410_p10 = scmp.ge.s32.totalorder %s1071_s15, 2  ;;  %s771_s19 = scalar_lea.sflag [#allocation6], %s770_s17 }
 0x2f4   : > { %p891_p2 = pnand %p1410_p10, %p1409_p7 }
 0x2f6   : > { %1054 = dma.done.wait (!%p891_p2), %s771_s19, 256  }
 0x2f7   : > { %1056 = vsyncadd (!%p891_p2), %s771_s19, 4294967040  ;;  %p16_p4 = scmp.ge.s32.totalorder %s1160_s18, 4   ;;  %s1411_s12 = smov %s1063_s13 }
 0x2f8   : > { %s1412_s13 = smov %s1067_s14  ;;  %s1413_s14 = smov %s1172_s21 }
 0x2f9   : > { %s1414_s15 = smov %s1160_s18  ;;  %18 = sbr.rel (!%p16_p4) target bundleno = 5 (0x5), region = 77 }
 0x300   :  { %776 = vsyncpa [#allocation5], 1 }
 0x301   :  { %778 = vsyncpa [#allocation5 + $0x1], 1 }
 0x302   :  { %779 = vsyncpa [#allocation6], 1 }
 0x303   :  { %781 = vsyncpa [#allocation6 + $0x1], 1 }

</bundles_post_ra>
